<compile_context>
chip_gen: v5e
topology: v5e:2x2
jax: 0.10.0
libtpu: 0.0.40
codegen_flags: <defaults>
</compile_context>

<pallas_src>
import functools

import jax
import jax.numpy as jnp
from jax.experimental import pallas as pl
from jax.experimental.pallas import tpu as pltpu


def _round_up(x: int, m: int) -> int:
    return (x + m - 1) // m * m


def _fused_graphsage_kernel(adj_ref, deg_inv_ref, x_ref, *rest, num_layers: int):
    """All SAGEConv('mean') layers fused in one kernel body.

    adj_ref     : [N, N]   bf16, exact 0/1 adjacency (adj[dst, src] = 1)
    deg_inv_ref : [N, 1]   f32, 1 / max(in_degree, 1)
    x_ref       : [N, F0p] bf16, zero-padded input features
    rest        : per layer l: W_self [Flp, Fl1p] bf16, W_neigh [Flp, Fl1p] bf16,
                  bias [1, Fl1p] f32; final entry is out_ref [N, FLp] f32.
    """
    out_ref = rest[-1]
    wb_refs = rest[:-1]

    adj = adj_ref[...]            # bf16, loaded once, reused by every layer
    deg_inv = deg_inv_ref[...]    # f32 [N, 1]
    h = x_ref[...]                # bf16 [N, F0p]

    for l in range(num_layers):   # static unroll; h stays on-chip between layers
        w_self = wb_refs[3 * l][...]       # bf16
        w_neigh = wb_refs[3 * l + 1][...]  # bf16
        bias = wb_refs[3 * l + 2][...]     # f32

        # mean aggregation: bf16 matmul, f32 accumulation, f32 normalization
        agg = jnp.dot(adj, h, preferred_element_type=jnp.float32) * deg_inv

        # self + neighbor transform as two accumulating dots (no concat copy)
        h_new = (jnp.dot(h, w_self, preferred_element_type=jnp.float32)
                 + jnp.dot(agg.astype(jnp.bfloat16), w_neigh,
                           preferred_element_type=jnp.float32)
                 + bias)                                        # f32

        if l != num_layers - 1:
            h_new = jnp.maximum(h_new, 0.0)                     # ReLU (f32 VPU)
            h = h_new.astype(jnp.bfloat16)                      # next-layer input
        else:
            out_ref[...] = h_new.astype(out_ref.dtype)


def graphsage_forward(adj, deg_inv, features, params):
    """Full GraphSAGE forward in a single fused Pallas call.

    adj:      [N, N] with adj[dst, src] = 1.0
    deg_inv:  [N, 1] = 1 / max(in_degree, 1)
    features: [N, in_feats]
    params:   list of (W_self [Fin,Fout], W_neigh [Fin,Fout], bias [1,Fout])
    """
    n, in_feats = features.shape
    num_layers = len(params)
    out_feats = params[-1][0].shape[1]

    # per-layer feature dims, each padded to a 128-lane multiple independently
    dims = [in_feats] + [p[0].shape[1] for p in params]
    dims_p = [_round_up(d, 128) for d in dims]

    # host-side prep (in a real pipeline adj_bf16 / padded weights are cached
    # across calls; only the features change per forward)
    adj_bf16 = adj.astype(jnp.bfloat16)                     # exact 0/1 values
    deg_inv_f32 = deg_inv.astype(jnp.float32)
    x_p = (jnp.zeros((n, dims_p[0]), jnp.bfloat16)
           .at[:, :in_feats].set(features.astype(jnp.bfloat16)))

    flat_inputs = [adj_bf16, deg_inv_f32, x_p]
    for l, (w_self, w_neigh, b) in enumerate(params):
        fi, fo = w_self.shape
        fip, fop = dims_p[l], dims_p[l + 1]
        ws_p = (jnp.zeros((fip, fop), jnp.bfloat16)
                .at[:fi, :fo].set(w_self.astype(jnp.bfloat16)))
        wn_p = (jnp.zeros((fip, fop), jnp.bfloat16)
                .at[:fi, :fo].set(w_neigh.astype(jnp.bfloat16)))
        b_p = jnp.zeros((1, fop), jnp.float32).at[:, :fo].set(b)
        flat_inputs += [ws_p, wn_p, b_p]

    out_pad = dims_p[-1]

    # VMEM budget: inputs + output + a few f32 working buffers, with headroom;
    # capped at 64 MiB (v7x physical VMEM).  Beyond that a tiled path is needed.
    needed = sum(a.size * a.dtype.itemsize for a in flat_inputs)
    needed += n * out_pad * 4                      # output
    needed += 4 * n * max(dims_p) * 4              # h / agg / h_new temps
    vmem_limit = int(min(max(2 * needed, 32 * 1024 * 1024), 64 * 1024 * 1024))

    # Full-array VMEM residency, no pipeline double-buffering for grid=().
    vmem_spec = pl.BlockSpec(memory_space=pltpu.MemorySpace.VMEM)

    out_p = pl.pallas_call(
        functools.partial(_fused_graphsage_kernel, num_layers=num_layers),
        out_shape=jax.ShapeDtypeStruct((n, out_pad), jnp.float32),
        grid=(),
        in_specs=[vmem_spec] * len(flat_inputs),
        out_specs=vmem_spec,
        compiler_params=pltpu.CompilerParams(vmem_limit_bytes=vmem_limit),
    )(*flat_inputs)

    return out_p[:, :out_feats]


def _init_params(key, in_feats, h_feats, out_feats, n_layers):
    """Deterministic parameter init mirroring GraphSAGE.__init__ layer shapes."""
    dims = [(in_feats, h_feats)]
    dims += [(h_feats, h_feats)] * (n_layers - 1)
    dims += [(h_feats, out_feats)]
    params = []
    for (fi, fo) in dims:
        key, k1, k2 = jax.random.split(key, 3)
        w_self = jax.random.normal(k1, (fi, fo), jnp.float32) * 0.1
        w_neigh = jax.random.normal(k2, (fi, fo), jnp.float32) * 0.1
        b = jnp.zeros((1, fo), jnp.float32)
        params.append((w_self, w_neigh, b))
    return params


def _reference_forward(adj, deg_inv, features, params):
    """Pure-JAX f32 reference (unfused, unpadded)."""
    h = features
    for i, (w_self, w_neigh, b) in enumerate(params):
        agg = (adj @ h) * deg_inv
        h = h @ w_self + agg @ w_neigh + b
        if i != len(params) - 1:
            h = jnp.maximum(h, 0.0)
    return h


if __name__ == "__main__":
    key = jax.random.PRNGKey(0)

    N = 64          # number of nodes
    in_feats = 16
    h_feats = 32
    out_feats = 8
    n_layers = 2    # -> total n_layers + 1 = 3 SAGEConv layers

    # deterministic random graph (adj[dst, src] = 1.0 if edge src->dst)
    key, k_adj, k_feat = jax.random.split(key, 3)
    adj = (jax.random.uniform(k_adj, (N, N)) < 0.1).astype(jnp.float32)
    adj = adj * (1.0 - jnp.eye(N, dtype=jnp.float32))      # no self loops
    deg = jnp.sum(adj, axis=1, keepdims=True)              # in-degree [N, 1]
    deg_inv = 1.0 / jnp.maximum(deg, 1.0)                  # 0-degree -> mean = 0

    features = jax.random.normal(k_feat, (N, in_feats), jnp.float32)

    params = _init_params(jax.random.PRNGKey(42), in_feats, h_feats, out_feats,
                          n_layers)

    out = graphsage_forward(adj, deg_inv, features, params)
    out = jax.block_until_ready(out)

    ref = _reference_forward(adj, deg_inv, features, params)
    assert out.shape == (N, out_feats)
    max_err = float(jnp.max(jnp.abs(out - ref)))
    # bf16 inputs with f32 accumulation: allow bf16-level error vs f32 reference
    assert jnp.allclose(out, ref, atol=3e-2, rtol=3e-2), f"max abs err {max_err}"

    print("KERNEL_OK")
</pallas_src>

<mosaic_0001>
module attributes {stable_mosaic.version = 11 : i64} {
  func.func @_fused_graphsage_kernel(%arg0: memref<64x64xbf16, #tpu.memory_space<vmem>>, %arg1: memref<64x1xf32, #tpu.memory_space<vmem>>, %arg2: memref<64x128xbf16, #tpu.memory_space<vmem>>, %arg3: memref<128x128xbf16, #tpu.memory_space<vmem>>, %arg4: memref<128x128xbf16, #tpu.memory_space<vmem>>, %arg5: memref<1x128xf32, #tpu.memory_space<vmem>>, %arg6: memref<128x128xbf16, #tpu.memory_space<vmem>>, %arg7: memref<128x128xbf16, #tpu.memory_space<vmem>>, %arg8: memref<1x128xf32, #tpu.memory_space<vmem>>, %arg9: memref<128x128xbf16, #tpu.memory_space<vmem>>, %arg10: memref<128x128xbf16, #tpu.memory_space<vmem>>, %arg11: memref<1x128xf32, #tpu.memory_space<vmem>>, %arg12: memref<64x128xf32, #tpu.memory_space<vmem>>) attributes {dimension_semantics = [], scalar_prefetch = 0 : i64, scratch_operands = 0 : i64, tpu.core_type = #tpu.core_type<tc>} {
    %c0 = arith.constant 0 : index
    %c0_0 = arith.constant 0 : index
    %0 = vector.load %arg0[%c0, %c0_0] : memref<64x64xbf16, #tpu.memory_space<vmem>>, vector<64x64xbf16>
    %c0_1 = arith.constant 0 : index
    %c0_2 = arith.constant 0 : index
    %1 = vector.load %arg1[%c0_1, %c0_2] : memref<64x1xf32, #tpu.memory_space<vmem>>, vector<64x1xf32>
    %c0_3 = arith.constant 0 : index
    %c0_4 = arith.constant 0 : index
    %2 = vector.load %arg2[%c0_3, %c0_4] : memref<64x128xbf16, #tpu.memory_space<vmem>>, vector<64x128xbf16>
    %c0_5 = arith.constant 0 : index
    %c0_6 = arith.constant 0 : index
    %3 = vector.load %arg3[%c0_5, %c0_6] : memref<128x128xbf16, #tpu.memory_space<vmem>>, vector<128x128xbf16>
    %c0_7 = arith.constant 0 : index
    %c0_8 = arith.constant 0 : index
    %4 = vector.load %arg4[%c0_7, %c0_8] : memref<128x128xbf16, #tpu.memory_space<vmem>>, vector<128x128xbf16>
    %c0_9 = arith.constant 0 : index
    %c0_10 = arith.constant 0 : index
    %5 = vector.load %arg5[%c0_9, %c0_10] : memref<1x128xf32, #tpu.memory_space<vmem>>, vector<1x128xf32>
    %cst = arith.constant dense<0.000000e+00> : vector<64x128xf32>
    %6 = tpu.matmul %0, %2, %cst {dimension_numbers = #tpu.dot_dimension_numbers<[1], [0], [0], [1], [0, 0, 1, 1], [], []>} : vector<64x64xbf16>, vector<64x128xbf16>, vector<64x128xf32> -> vector<64x128xf32>
    %7 = vector.broadcast %1 : vector<64x1xf32> to vector<64x128xf32>
    %8 = arith.mulf %6, %7 : vector<64x128xf32>
    %cst_11 = arith.constant dense<0.000000e+00> : vector<64x128xf32>
    %9 = tpu.matmul %2, %3, %cst_11 {dimension_numbers = #tpu.dot_dimension_numbers<[1], [0], [0], [1], [0, 0, 1, 1], [], []>} : vector<64x128xbf16>, vector<128x128xbf16>, vector<64x128xf32> -> vector<64x128xf32>
    %10 = arith.truncf %8 : vector<64x128xf32> to vector<64x128xbf16>
    %cst_12 = arith.constant dense<0.000000e+00> : vector<64x128xf32>
    %11 = tpu.matmul %10, %4, %cst_12 {dimension_numbers = #tpu.dot_dimension_numbers<[1], [0], [0], [1], [0, 0, 1, 1], [], []>} : vector<64x128xbf16>, vector<128x128xbf16>, vector<64x128xf32> -> vector<64x128xf32>
    %12 = arith.addf %9, %11 : vector<64x128xf32>
    %13 = vector.broadcast %5 : vector<1x128xf32> to vector<64x128xf32>
    %14 = arith.addf %12, %13 : vector<64x128xf32>
    %cst_13 = arith.constant 0.000000e+00 : f32
    %15 = vector.broadcast %cst_13 : f32 to vector<64x128xf32>
    %16 = arith.maximumf %14, %15 : vector<64x128xf32>
    %17 = arith.truncf %16 : vector<64x128xf32> to vector<64x128xbf16>
    %c0_14 = arith.constant 0 : index
    %c0_15 = arith.constant 0 : index
    %18 = vector.load %arg6[%c0_14, %c0_15] : memref<128x128xbf16, #tpu.memory_space<vmem>>, vector<128x128xbf16>
    %c0_16 = arith.constant 0 : index
    %c0_17 = arith.constant 0 : index
    %19 = vector.load %arg7[%c0_16, %c0_17] : memref<128x128xbf16, #tpu.memory_space<vmem>>, vector<128x128xbf16>
    %c0_18 = arith.constant 0 : index
    %c0_19 = arith.constant 0 : index
    %20 = vector.load %arg8[%c0_18, %c0_19] : memref<1x128xf32, #tpu.memory_space<vmem>>, vector<1x128xf32>
    %cst_20 = arith.constant dense<0.000000e+00> : vector<64x128xf32>
    %21 = tpu.matmul %0, %17, %cst_20 {dimension_numbers = #tpu.dot_dimension_numbers<[1], [0], [0], [1], [0, 0, 1, 1], [], []>} : vector<64x64xbf16>, vector<64x128xbf16>, vector<64x128xf32> -> vector<64x128xf32>
    %22 = vector.broadcast %1 : vector<64x1xf32> to vector<64x128xf32>
    %23 = arith.mulf %21, %22 : vector<64x128xf32>
    %cst_21 = arith.constant dense<0.000000e+00> : vector<64x128xf32>
    %24 = tpu.matmul %17, %18, %cst_21 {dimension_numbers = #tpu.dot_dimension_numbers<[1], [0], [0], [1], [0, 0, 1, 1], [], []>} : vector<64x128xbf16>, vector<128x128xbf16>, vector<64x128xf32> -> vector<64x128xf32>
    %25 = arith.truncf %23 : vector<64x128xf32> to vector<64x128xbf16>
    %cst_22 = arith.constant dense<0.000000e+00> : vector<64x128xf32>
    %26 = tpu.matmul %25, %19, %cst_22 {dimension_numbers = #tpu.dot_dimension_numbers<[1], [0], [0], [1], [0, 0, 1, 1], [], []>} : vector<64x128xbf16>, vector<128x128xbf16>, vector<64x128xf32> -> vector<64x128xf32>
    %27 = arith.addf %24, %26 : vector<64x128xf32>
    %28 = vector.broadcast %20 : vector<1x128xf32> to vector<64x128xf32>
    %29 = arith.addf %27, %28 : vector<64x128xf32>
    %cst_23 = arith.constant 0.000000e+00 : f32
    %30 = vector.broadcast %cst_23 : f32 to vector<64x128xf32>
    %31 = arith.maximumf %29, %30 : vector<64x128xf32>
    %32 = arith.truncf %31 : vector<64x128xf32> to vector<64x128xbf16>
    %c0_24 = arith.constant 0 : index
    %c0_25 = arith.constant 0 : index
    %33 = vector.load %arg9[%c0_24, %c0_25] : memref<128x128xbf16, #tpu.memory_space<vmem>>, vector<128x128xbf16>
    %c0_26 = arith.constant 0 : index
    %c0_27 = arith.constant 0 : index
    %34 = vector.load %arg10[%c0_26, %c0_27] : memref<128x128xbf16, #tpu.memory_space<vmem>>, vector<128x128xbf16>
    %c0_28 = arith.constant 0 : index
    %c0_29 = arith.constant 0 : index
    %35 = vector.load %arg11[%c0_28, %c0_29] : memref<1x128xf32, #tpu.memory_space<vmem>>, vector<1x128xf32>
    %cst_30 = arith.constant dense<0.000000e+00> : vector<64x128xf32>
    %36 = tpu.matmul %0, %32, %cst_30 {dimension_numbers = #tpu.dot_dimension_numbers<[1], [0], [0], [1], [0, 0, 1, 1], [], []>} : vector<64x64xbf16>, vector<64x128xbf16>, vector<64x128xf32> -> vector<64x128xf32>
    %37 = vector.broadcast %1 : vector<64x1xf32> to vector<64x128xf32>
    %38 = arith.mulf %36, %37 : vector<64x128xf32>
    %cst_31 = arith.constant dense<0.000000e+00> : vector<64x128xf32>
    %39 = tpu.matmul %32, %33, %cst_31 {dimension_numbers = #tpu.dot_dimension_numbers<[1], [0], [0], [1], [0, 0, 1, 1], [], []>} : vector<64x128xbf16>, vector<128x128xbf16>, vector<64x128xf32> -> vector<64x128xf32>
    %40 = arith.truncf %38 : vector<64x128xf32> to vector<64x128xbf16>
    %cst_32 = arith.constant dense<0.000000e+00> : vector<64x128xf32>
    %41 = tpu.matmul %40, %34, %cst_32 {dimension_numbers = #tpu.dot_dimension_numbers<[1], [0], [0], [1], [0, 0, 1, 1], [], []>} : vector<64x128xbf16>, vector<128x128xbf16>, vector<64x128xf32> -> vector<64x128xf32>
    %42 = arith.addf %39, %41 : vector<64x128xf32>
    %43 = vector.broadcast %35 : vector<1x128xf32> to vector<64x128xf32>
    %44 = arith.addf %42, %43 : vector<64x128xf32>
    %c0_33 = arith.constant 0 : index
    %c0_34 = arith.constant 0 : index
    %45 = vector.load %arg12[%c0_33, %c0_34] : memref<64x128xf32, #tpu.memory_space<vmem>>, vector<64x128xf32>
    tpu.vector_store %arg12[%c0_33, %c0_34], %44 {strides = array<i32>} : memref<64x128xf32, #tpu.memory_space<vmem>>, vector<64x128xf32>,
    return
  }
}

</mosaic_0001>

<bundles_post_ra>
// kernel: tpu_custom_call.1
= control target key start
LH: loop header
LB: loop body
LE: loop exit
PB: predicated region body
PF: predicated region fallthrough
CT: control target
= control target key end

     0   :  { %17 = vsyncpa [#allocation3], 0  ;;  %s1823_s0 = inlined_call_operand.hbm [shape: bf16[64,64], index: 0, kind: input, shape index: {}]   ;;  %s1824_s1 = inlined_call_operand.vmem [shape: f32[64,1], index: 1, kind: input, shape index: {}]   ;;  %s1825_s2 = inlined_call_operand.hbm [shape: bf16[64,128], index: 2, kind: input, shape index: {}]   ;;  %s1826_s3 = inlined_call_operand.vmem [shape: bf16[128,128], index: 3, kind: input, shape index: {}]   ;;  %s1827_s4 = inlined_call_operand.hbm [shape: bf16[128,128], index: 4, kind: input, shape index: {}]   ;;  %s1828_s5 = inlined_call_operand.vmem [shape: f32[1,128], index: 5, kind: input, shape index: {}]   ;;  %s1829_s6 = inlined_call_operand.hbm [shape: bf16[128,128], index: 6, kind: input, shape index: {}]   ;;  %s1830_s7 = inlined_call_operand.hbm [shape: bf16[128,128], index: 7, kind: input, shape index: {}]   ;;  %s1831_s8 = inlined_call_operand.vmem [shape: f32[1,128], index: 8, kind: input, shape index: {}]   ;;  %s1832_s9 = inlined_call_operand.hbm [shape: bf16[128,128], index: 9, kind: input, shape index: {}]   ;;  %s1833_s10 = inlined_call_operand.hbm [shape: bf16[128,128], index: 10, kind: input, shape index: {}]   ;;  %s1834_s11 = inlined_call_operand.vmem [shape: f32[1,128], index: 11, kind: input, shape index: {}]   ;;  %s1835_s12 = inlined_call_operand.hbm [shape: f32[64,128], index: 12, kind: output, shape index: {}]  }
   0x1   :  { %18 = vsyncpa [#allocation6], 0 }
   0x2   :  { %19 = vsyncpa [#allocation9], 0 }
   0x3   :  { %20 = vsyncpa [#allocation12], 0 }
   0x4   :  { %21 = vsyncpa [#allocation4], 0  ;;  %s41_s23 = sshll.u32 %s1825_s2, 4  ;;  %s1561_s24 = smov [#allocation5]   ;;  %s42_s23 = int_to_ptr.hbm [resolvable:$true] %s41_s23 }
   0x5   :  { %s43_s25 = sshll.u32 %s1561_s24, 4  ;;  %s71_s28 = sshll.u32 %s1829_s6, 4  ;;  %s44_s25 = int_to_ptr.vmem [resolvable:$true] %s43_s25  ;;  %s72_s28 = int_to_ptr.hbm [resolvable:$true] %s71_s28 }
   0x6   :  { %s1562_s29 = smov 64   ;;  %s1563_s30 = smov 4  }
   0x7   :  { %49 = dma.hbm_to_vmem [thread:$0]  %s42_s23, 512, %s44_s25, [#allocation6], %s1562_s29, %s1562_s29, %s1563_s30  }
   0x8   :  { %s1564_s13 = smov [#allocation8]   ;;  %s99_s2 = sshll.u32 %s1832_s9, 4  ;;  %s100_s2 = int_to_ptr.hbm [resolvable:$true] %s99_s2 }
   0x9   :  { %s73_s14 = sshll.u32 %s1564_s13, 4  ;;  %s26_s18 = sshll.u32 %s1823_s0, 4  ;;  %s74_s14 = int_to_ptr.vmem [resolvable:$true] %s73_s14  ;;  %s27_s18 = int_to_ptr.hbm [resolvable:$true] %s26_s18 }
   0xa   :  { %79 = dma.hbm_to_vmem [thread:$0]  %s72_s28, 1024, %s74_s14, [#allocation9], %s1562_s29, %s1562_s29, %s1563_s30  }
   0xb   :  { %s1565_s19 = smov [#allocation11]   ;;  %s1566_s21 = smov [#allocation2]  }
   0xc   :  { %s101_s20 = sshll.u32 %s1565_s19, 4  ;;  %s28_s9 = sshll.u32 %s1566_s21, 4  ;;  %s102_s20 = int_to_ptr.vmem [resolvable:$true] %s101_s20  ;;  %s29_s9 = int_to_ptr.vmem [resolvable:$true] %s28_s9 }
   0xd   :  { %107 = dma.hbm_to_vmem [thread:$0]  %s100_s2, 1024, %s102_s20, [#allocation12], %s1562_s29, %s1562_s29, %s1563_s30  }
   0xe   :  { %s56_s24 = sshll.u32 %s1827_s4, 4  ;;  %s84_s26 = sshll.u32 %s1830_s7, 4  ;;  %s57_s24 = int_to_ptr.hbm [resolvable:$true] %s56_s24  ;;  %s85_s26 = int_to_ptr.hbm [resolvable:$true] %s84_s26 }
   0xf   :  { %34 = dma.hbm_to_vmem [thread:$0]  %s27_s18, 512, %s29_s9, [#allocation3], %s1562_s29, %s1562_s29, %s1563_s30  }
  0x10   :  { %s1567_s27 = smov [#allocation7]   ;;  %s1568_s13 = smov [#allocation10]  }
  0x11   :  { %s58_s28 = sshll.u32 %s1567_s27, 4  ;;  %s86_s4 = sshll.u32 %s1568_s13, 4  ;;  %s59_s28 = int_to_ptr.vmem [resolvable:$true] %s58_s28  ;;  %s87_s4 = int_to_ptr.vmem [resolvable:$true] %s86_s4 }
  0x12   :  { %64 = dma.hbm_to_vmem [thread:$0]  %s57_s24, 1024, %s59_s28, [#allocation6], %s1562_s29, %s1562_s29, %s1563_s30  }
  0x13   :  { %s112_s16 = sshll.u32 %s1833_s10, 4  ;;  %s1569_s7 = smov [#allocation13]   ;;  %s113_s16 = int_to_ptr.hbm [resolvable:$true] %s112_s16 }
  0x14   :  { %92 = dma.hbm_to_vmem [thread:$0]  %s85_s26, 1024, %s87_s4, [#allocation9], %s1562_s29, %s1562_s29, %s1563_s30  }
  0x15   :  { %s114_s2 = sshll.u32 %s1569_s7, 4  ;;  %s115_s2 = int_to_ptr.vmem [resolvable:$true] %s114_s2 }
  0x16   :  { %120 = dma.hbm_to_vmem [thread:$0]  %s113_s16, 1024, %s115_s2, [#allocation12], %s1562_s29, %s1562_s29, %s1563_s30  }
  0x17   :  { %1551 = dma.done.wait [#allocation3], 512  }
  0x18   :  { %1552 = vsyncadd [#allocation3], 4294966784 }
  0x19   :  { %1553 = dma.done.wait [#allocation6], 1536  }
  0x1a   :  { %1554 = vsyncadd [#allocation6], 4294965760 }
  0x1b   :  { %1555 = dma.done.wait [#allocation9], 2048  }
  0x1c   :  { %1556 = vsyncadd [#allocation9], 4294965248 }
  0x1d   :  { %1557 = dma.done.wait [#allocation12], 2048  }
  0x1e   :  { %1558 = vsyncadd [#allocation12], 4294965248  ;;  %v1570_v0 = vmov 0   ;;  %v1681_v1 = vld [vmem:[#allocation5 + $0x18] sm:$0xff]  ;;  %v160_v2 = vld [vmem:[%s1824_s1] sm:$0xff]  ;;  %vm253_vm0 = vcmask 523264  }
  0x1f   :  { %1353 = vset.pattern.permute.xlu0 %v1570_v0  ;;  %1354 = vset.pattern.permute.xlu1 %v1570_v0  ;;  %v1688_v3 = vld [vmem:[#allocation5 + $0x10] sm:$0xff]  ;;  %v164_v5 = vld [vmem:[%s1824_s1 + $0x20] sm:$0xff]  ;;  %v1295_v6 = vld [vmem:[%s1826_s3 + $0x38] sm:$0xff]  ;;  %s1028_s24 = sshll.u32 %s1835_s12, 4  ;;  %s1572_s0 = smov 128   ;;  %s1029_s24 = int_to_ptr.hbm [resolvable:$true] %s1028_s24 }
  0x20   :  { %1355 = vset.pattern.permute.xlu2 %v1570_v0  ;;  %270 = vmatpush.bf16.msra.mxu0 %v1681_v1  ;;  %v162_v4 = vld [vmem:[%s1824_s1 + $0x10] sm:$0xff]  ;;  %v1285_v7 = vld [vmem:[#allocation5 + $0x8] sm:$0xff]  ;;  %v1303_v8 = vld [vmem:[#allocation7 + $0x38] sm:$0xff]  ;;  %s1573_s25 = smov 8  }
  0x21   :  { %1336 = vmatpush.bf16.msra.mxu3 %v1681_v1  ;;  %297 = vperm.xlu0 %1353, %v160_v2   ;;  %v161_v9 = vld [vmem:[%s1824_s1 + $0x8] sm:$0xff]  ;;  %v163_v10 = vld [vmem:[%s1824_s1 + $0x18] sm:$0xff]  ;;  %v1294_v11 = vld [vmem:[%s1826_s3 + $0x30] sm:$0xff] }
  0x22   :  { %307 = vperm.xlu1 %1354, %v162_v4   ;;  %317 = vperm.xlu2 %1355, %v164_v5   ;;  %v1284_v12 = vld [vmem:[#allocation5] sm:$0xff]  ;;  %v165_v13 = vld [vmem:[%s1824_s1 + $0x28] sm:$0xff]  ;;  %v1718_v16 = vld [vmem:[#allocation2 + $0x10] sm:$0xff] }
  0x23   :  { %472 = vmatpush.bf16.msra.mxu2 %v1295_v6  ;;  %395 = vmatpush.bf16.msra.mxu1 %v1303_v8  ;;  %v1293_v14 = vld [vmem:[%s1826_s3 + $0x28] sm:$0xff]  ;;  %v1716_v15 = vld [vmem:[#allocation2] sm:$0xff]  ;;  %v166_v17 = vld [vmem:[%s1824_s1 + $0x30] sm:$0xff] }
  0x24   :  { %271 = vmatpush.bf16.msra.mxu0 %v1688_v3  ;;  %v167_v18 = vld [vmem:[%s1824_s1 + $0x38] sm:$0xff]  ;;  %v1292_v19 = vld [vmem:[%s1826_s3 + $0x20] sm:$0xff]  ;;  %v1736_v21 = vld [vmem:[#allocation2 + $0x8] sm:$0xff] }
  0x25   :  { %1337 = vmatpush.bf16.msra.mxu3 %v1688_v3  ;;  %v1291_v20 = vld [vmem:[%s1826_s3 + $0x18] sm:$0xff]  ;;  %v1302_v23 = vld [vmem:[#allocation7 + $0x30] sm:$0xff]  ;;  %v1301_v25 = vld [vmem:[#allocation7 + $0x28] sm:$0xff] }
  0x26   :  { %v1738_v22 = vld [vmem:[#allocation2 + $0x18] sm:$0xff]  ;;  %v1290_v24 = vld [vmem:[%s1826_s3 + $0x10] sm:$0xff]  ;;  %v1289_v26 = vld [vmem:[%s1826_s3 + $0x8] sm:$0xff] }
  0x27   :  { %473 = vmatpush.bf16.msra.mxu2 %v1294_v11  ;;  %396 = vmatpush.bf16.msra.mxu1 %v1302_v23  ;;  %v1300_v27 = vld [vmem:[#allocation7 + $0x20] sm:$0xff]  ;;  %v1299_v29 = vld [vmem:[#allocation7 + $0x18] sm:$0xff]  ;;  %v1298_v30 = vld [vmem:[#allocation7 + $0x10] sm:$0xff] }
  0x28   :  { %272 = vmatpush.bf16.msra.mxu0 %v1285_v7  ;;  %v1288_v28 = vld [vmem:[%s1826_s3] sm:$0xff]  ;;  %v1297_v31 = vld [vmem:[#allocation7 + $0x8] sm:$0xff] }
  0x29   :  { %1338 = vmatpush.bf16.msra.mxu3 %v1285_v7  ;;  %302 = vperm.xlu0 %1353, %v161_v9   ;;  %v1296_v32 = vld [vmem:[#allocation7] sm:$0xff] }
  0x2a   :  { %312 = vperm.xlu1 %1354, %v163_v10   ;;  %322 = vperm.xlu2 %1355, %v165_v13   ;;  %v1356_v13 = vld [vmem:[%s1828_s5] ss:$0 sm:$0xff] }
  0x2b   :  { %474 = vmatpush.bf16.msra.mxu2 %v1293_v14  ;;  %397 = vmatpush.bf16.msra.mxu1 %v1301_v25 }
  0x2c   :  { %273 = vmatpush.bf16.msra.mxu0 %v1284_v12 }
  0x2d   :  { %1339 = vmatpush.bf16.msra.mxu3 %v1284_v12 }
  0x2f   :  { %1076 = vmatmul.msk.bf16.vlgmr.msra.gmra.mxu0 %vm253_vm0, %v1716_v15  ;;  %475 = vmatpush.bf16.msra.mxu2 %v1292_v19 }
  0x30   :  { %1078 = vmatmul.msk.bf16.vlgmr.msra.gmra.mxu3 %vm253_vm0, %v1718_v16  ;;  %398 = vmatpush.bf16.msra.mxu1 %v1300_v27 }
  0x31   :  { %327 = vperm.xlu0 %1353, %v166_v17  }
  0x32   :  { %332 = vperm.xlu1 %1354, %v167_v18  }
  0x33   :  { %476 = vmatpush.bf16.msra.mxu2 %v1291_v20 }
  0x34   :  { %399 = vmatpush.bf16.msra.mxu1 %v1299_v29 }
  0x37   :  { %477 = vmatpush.bf16.msra.mxu2 %v1290_v24 }
  0x38   :  { %400 = vmatpush.bf16.msra.mxu1 %v1298_v30 }
  0x3b   :  { %478 = vmatpush.bf16.msra.mxu2 %v1289_v26 }
  0x3c   :  { %401 = vmatpush.bf16.msra.mxu1 %v1297_v31 }
  0x3f   :  { %1077 = vmatmul.msk.bf16.gmra.mxu0 %vm253_vm0, %v1736_v21  ;;  %479 = vmatpush.bf16.msra.mxu2 %v1288_v28 }
  0x40   :  { %1079 = vmatmul.msk.bf16.gmra.mxu3 %vm253_vm0, %v1738_v22  ;;  %402 = vmatpush.bf16.msra.mxu1 %v1296_v32 }
  0x42   :  { %480 = vmatmul.bf16.vlgmr.msra.gmra.mxu2 %v1284_v12 }
  0x52   :  { %485 = vmatmul.bf16.gmra.mxu2 %v1285_v7 }
  0x62   :  { %490 = vmatmul.bf16.gmra.mxu2 %v1688_v3 }
  0x72   :  { %495 = vmatmul.bf16.gmra.mxu2 %v1681_v1 }
  0x7c   :  { %v1767_v47 = vpop.permute.xlu2 %317 }
  0x84   :  { %v1769_v50 = vpop.permute.xlu2 %322 }
  0x93   :  { %v1754_v33 = vpop.permute.xlu0 %297 }
  0x94   :  { %v1761_v40 = vpop.permute.xlu1 %307 }
  0x9b   :  { %v1757_v35 = vpop.permute.xlu0 %302 }
  0x9c   :  { %v1763_v43 = vpop.permute.xlu1 %312 }
  0xa3   :  { %v1776_v58 = vpop.permute.xlu0 %327 }
  0xa4   :  { %v1773_v56 = vpop.permute.xlu1 %332 }
  0xac   :  { %v275_v34 = vpop.f32.mrf.mxu0 }
  0xad   :  { %v335_v37 = vmul.f32 %v1754_v33, %v275_v34 }
  0xb3   :  { %v285_v42 = vpop.f32.mrf.mxu3 }
  0xb4   :  { %v277_v36 = vpop.f32.mrf.mxu0  ;;  %v339_v52 = vmul.f32 %v1767_v47, %v285_v42 }
  0xb5   :  { %v336_v38 = vmul.f32 %v1757_v35, %v277_v36 }
  0xb7   :  { %v343_v39 = vpack.c.bf16 %v336_v38, %v335_v37 }
  0xb9   :  { %403 = vmatmul.bf16.vlgmr.msra.gmra.mxu1 %v343_v39 }
  0xbb   :  { %v287_v49 = vpop.f32.mrf.mxu3 }
  0xbc   :  { %v280_v41 = vpop.f32.mrf.mxu0  ;;  %v340_v51 = vmul.f32 %v1769_v50, %v287_v49 }
  0xbd   :  { %v337_v45 = vmul.f32 %v1761_v40, %v280_v41 }
  0xbe   :  { %v345_v54 = vpack.c.bf16 %v340_v51, %v339_v52  ;;  %v1311_v52 = vld [vmem:[#allocation8 + $0x38] sm:$0xff] }
  0xc3   :  { %v290_v53 = vpop.f32.mrf.mxu3 }
  0xc4   :  { %v282_v44 = vpop.f32.mrf.mxu0  ;;  %v341_v59 = vmul.f32 %v1776_v58, %v290_v53  ;;  %v1310_v53 = vld [vmem:[#allocation8 + $0x30] sm:$0xff] }
  0xc5   :  { %v338_v46 = vmul.f32 %v1763_v43, %v282_v44  ;;  %v481_v61 = vpop.f32.mrf.mxu2 }
  0xc7   :  { %v344_v48 = vpack.c.bf16 %v338_v46, %v337_v45 }
  0xc9   :  { %408 = vmatmul.bf16.gmra.mxu1 %v344_v48 }
  0xcb   :  { %v292_v55 = vpop.f32.mrf.mxu3 }
  0xcc   :  { %v342_v57 = vmul.f32 %v1773_v56, %v292_v55  ;;  %v1308_v55 = vld [vmem:[#allocation8 + $0x20] sm:$0xff] }
  0xcd   :  { %v483_v62 = vpop.f32.mrf.mxu2 }
  0xce   :  { %v346_v60 = vpack.c.bf16 %v342_v57, %v341_v59  ;;  %v1307_v57 = vld [vmem:[#allocation8 + $0x18] sm:$0xff]  ;;  %v1306_v59 = vld [vmem:[#allocation8 + $0x10] sm:$0xff] }
  0xd5   :  { %v486_v1 = vpop.f32.mrf.mxu2 }
  0xd9   :  { %413 = vmatmul.bf16.gmra.mxu1 %v345_v54  ;;  %v1309_v54 = vld [vmem:[#allocation8 + $0x28] sm:$0xff] }
  0xdd   :  { %v488_v4 = vpop.f32.mrf.mxu2 }
  0xe5   :  { %v491_v6 = vpop.f32.mrf.mxu2 }
  0xe9   :  { %418 = vmatmul.bf16.gmra.mxu1 %v346_v60  ;;  %v1305_v60 = vld [vmem:[#allocation8 + $0x8] sm:$0xff] }
  0xed   :  { %v493_v8 = vpop.f32.mrf.mxu2 }
  0xf5   :  { %v496_v10 = vpop.f32.mrf.mxu2 }
  0xfd   :  { %v498_v17 = vpop.f32.mrf.mxu2 }
 0x136   :  { %v404_v63 = vpop.f32.mrf.mxu1 }
 0x137   :  { %v482_v0 = vadd.f32 %v481_v61, %v404_v63  ;;  %v1304_v61 = vld [vmem:[#allocation8] sm:$0xff]  ;;  %v1318_v63 = vld [vmem:[#allocation10 + $0x30] sm:$0xff] }
 0x139   :  { %v504_v44 = vadd.f32 %v1356_v13, %v482_v0  ;;  %v1317_v0 = vld [vmem:[#allocation10 + $0x28] sm:$0xff] }
 0x13b   :  { %v512_v49 = vmax.f32 %v504_v44, 0.0 }
 0x13e   :  { %v406_v2 = vpop.f32.mrf.mxu1 }
 0x13f   :  { %v484_v31 = vadd.f32 %v483_v62, %v406_v2  ;;  %v1319_v62 = vld [vmem:[#allocation10 + $0x38] sm:$0xff] }
 0x140   :  { %646 = vmatpush.bf16.msrb.mxu0 %v1319_v62  ;;  %v1315_v2 = vld [vmem:[#allocation10 + $0x18] sm:$0xff] }
 0x141   :  { %v505_v39 = vadd.f32 %v1356_v13, %v484_v31  ;;  %v1326_v31 = vld [vmem:[#allocation11 + $0x30] sm:$0xff] }
 0x143   :  { %v513_v46 = vmax.f32 %v505_v39, 0.0  ;;  %v1320_v39 = vld [vmem:[#allocation11] sm:$0xff] }
 0x144   :  { %647 = vmatpush.bf16.msrb.mxu0 %v1318_v63 }
 0x145   :  { %v520_v51 = vpack.c.bf16 %v513_v46, %v512_v49  ;;  %v1357_v46 = vld [vmem:[%s1831_s8] ss:$0 sm:$0xff] }
 0x146   :  { %v409_v3 = vpop.f32.mrf.mxu1 }
 0x147   :  { %v487_v27 = vadd.f32 %v486_v1, %v409_v3  ;;  %v1316_v1 = vld [vmem:[#allocation10 + $0x20] sm:$0xff]  ;;  %v1314_v3 = vld [vmem:[#allocation10 + $0x10] sm:$0xff] }
 0x148   :  { %648 = vmatpush.bf16.msrb.mxu0 %v1317_v0 }
 0x149   :  { %v506_v37 = vadd.f32 %v1356_v13, %v487_v27 }
 0x14b   :  { %v514_v45 = vmax.f32 %v506_v37, 0.0  ;;  %v1322_v37 = vld [vmem:[#allocation11 + $0x10] sm:$0xff] }
 0x14c   :  { %649 = vmatpush.bf16.msrb.mxu0 %v1316_v1 }
 0x14e   :  { %v411_v5 = vpop.f32.mrf.mxu1 }
 0x14f   :  { %v489_v24 = vadd.f32 %v488_v4, %v411_v5  ;;  %v1313_v4 = vld [vmem:[#allocation10 + $0x8] sm:$0xff]  ;;  %v1312_v5 = vld [vmem:[#allocation10] sm:$0xff] }
 0x150   :  { %650 = vmatpush.bf16.msrb.mxu0 %v1315_v2 }
 0x151   :  { %v507_v32 = vadd.f32 %v1356_v13, %v489_v24 }
 0x153   :  { %v515_v41 = vmax.f32 %v507_v32, 0.0  ;;  %v1325_v32 = vld [vmem:[#allocation11 + $0x28] sm:$0xff] }
 0x154   :  { %651 = vmatpush.bf16.msrb.mxu0 %v1314_v3 }
 0x155   :  { %v521_v48 = vpack.c.bf16 %v515_v41, %v514_v45 }
 0x156   :  { %v414_v7 = vpop.f32.mrf.mxu1 }
 0x157   :  { %v492_v19 = vadd.f32 %v491_v6, %v414_v7 }
 0x158   :  { %652 = vmatpush.bf16.msrb.mxu0 %v1313_v4 }
 0x159   :  { %v508_v28 = vadd.f32 %v1356_v13, %v492_v19 }
 0x15b   :  { %v516_v38 = vmax.f32 %v508_v28, 0.0 }
 0x15c   :  { %653 = vmatpush.bf16.msrb.mxu0 %v1312_v5 }
 0x15e   :  { %v416_v9 = vpop.f32.mrf.mxu1 }
 0x15f   :  { %v494_v14 = vadd.f32 %v493_v8, %v416_v9 }
 0x161   :  { %v509_v25 = vadd.f32 %v1356_v13, %v494_v14 }
 0x163   :  { %v517_v34 = vmax.f32 %v509_v25, 0.0 }
 0x165   :  { %v522_v42 = vpack.c.bf16 %v517_v34, %v516_v38  ;;  %v1324_v34 = vld [vmem:[#allocation11 + $0x20] sm:$0xff]  ;;  %v1321_v38 = vld [vmem:[#allocation11 + $0x8] sm:$0xff] }
 0x166   :  { %v419_v11 = vpop.f32.mrf.mxu1 }
 0x167   :  { %v497_v12 = vadd.f32 %v496_v10, %v419_v11 }
 0x169   :  { %v510_v20 = vadd.f32 %v1356_v13, %v497_v12 }
 0x16b   :  { %v518_v29 = vmax.f32 %v510_v20, 0.0 }
 0x16e   :  { %v421_v18 = vpop.f32.mrf.mxu1 }
 0x16f   :  { %v499_v23 = vadd.f32 %v498_v17, %v421_v18 }
 0x171   :  { %v511_v26 = vadd.f32 %v1356_v13, %v499_v23 }
 0x173   :  { %v519_v30 = vmax.f32 %v511_v26, 0.0 }
 0x175   :  { %v523_v36 = vpack.c.bf16 %v519_v30, %v518_v29  ;;  %v1327_v30 = vld [vmem:[#allocation11 + $0x38] sm:$0xff] }
 0x176   :  { %974 = vmatpush.bf16.msra.mxu0 %v1327_v30 }
 0x177   :  { %561 = vmatpush.bf16.msrb.mxu3 %v523_v36 }
 0x17a   :  { %975 = vmatpush.bf16.msra.mxu0 %v1326_v31  ;;  %v1335_v31 = vld [vmem:[#allocation13 + $0x38] sm:$0xff] }
 0x17b   :  { %562 = vmatpush.bf16.msrb.mxu3 %v522_v42  ;;  %897 = vmatpush.bf16.msrb.mxu2 %v1335_v31 }
 0x17e   :  { %976 = vmatpush.bf16.msra.mxu0 %v1325_v32  ;;  %v1334_v32 = vld [vmem:[#allocation13 + $0x30] sm:$0xff] }
 0x17f   :  { %563 = vmatpush.bf16.msrb.mxu3 %v521_v48  ;;  %898 = vmatpush.bf16.msrb.mxu2 %v1334_v32 }
 0x182   :  { %977 = vmatpush.bf16.msra.mxu0 %v1324_v34  ;;  %v1333_v34 = vld [vmem:[#allocation13 + $0x28] sm:$0xff] }
 0x183   :  { %564 = vmatpush.bf16.msrb.mxu3 %v520_v51  ;;  %899 = vmatpush.bf16.msrb.mxu2 %v1333_v34 }
 0x186   :  { %1144 = vmatmul.msk.bf16.vlgmr.msrb.gmra.mxu3 %vm253_vm0, %v1716_v15 }
 0x187   :  { %723 = vmatpush.bf16.msra.mxu3 %v1311_v52 }
 0x18b   :  { %724 = vmatpush.bf16.msra.mxu3 %v1310_v53 }
 0x18f   :  { %725 = vmatpush.bf16.msra.mxu3 %v1309_v54 }
 0x193   :  { %726 = vmatpush.bf16.msra.mxu3 %v1308_v55 }
 0x196   :  { %1145 = vmatmul.msk.bf16.gmra.mxu3 %vm253_vm0, %v1736_v21 }
 0x197   :  { %727 = vmatpush.bf16.msra.mxu3 %v1307_v57 }
 0x19b   :  { %728 = vmatpush.bf16.msra.mxu3 %v1306_v59 }
 0x19f   :  { %729 = vmatpush.bf16.msra.mxu3 %v1305_v60 }
 0x1a3   :  { %730 = vmatpush.bf16.msra.mxu3 %v1304_v61 }
 0x1a6   :  { %1146 = vmatmul.msk.bf16.gmra.mxu3 %vm253_vm0, %v1718_v16 }
 0x1b6   :  { %1147 = vmatmul.msk.bf16.gmra.mxu3 %vm253_vm0, %v1738_v22 }
 0x1c6   :  { %731 = vmatmul.bf16.vlgmr.msra.gmra.mxu3 %v520_v51 }
 0x1d6   :  { %736 = vmatmul.bf16.gmra.mxu3 %v521_v48 }
 0x1e6   :  { %741 = vmatmul.bf16.gmra.mxu3 %v522_v42 }
 0x1f6   :  { %746 = vmatmul.bf16.gmra.mxu3 %v523_v36  ;;  %v1323_v36 = vld [vmem:[#allocation11 + $0x18] sm:$0xff] }
 0x1f7   :  { %978 = vmatpush.bf16.msra.mxu0 %v1323_v36  ;;  %v1332_v36 = vld [vmem:[#allocation13 + $0x20] sm:$0xff] }
 0x1f8   :  { %900 = vmatpush.bf16.msrb.mxu2 %v1332_v36 }
 0x1fb   :  { %979 = vmatpush.bf16.msra.mxu0 %v1322_v37  ;;  %v1331_v37 = vld [vmem:[#allocation13 + $0x18] sm:$0xff] }
 0x1fc   :  { %901 = vmatpush.bf16.msrb.mxu2 %v1331_v37 }
 0x1ff   :  { %980 = vmatpush.bf16.msra.mxu0 %v1321_v38  ;;  %v1329_v38 = vld [vmem:[#allocation13 + $0x8] sm:$0xff] }
 0x203   :  { %981 = vmatpush.bf16.msra.mxu0 %v1320_v39 }
 0x209   :  { %v566_v6 = vpop.f32.mrf.mxu3 }
 0x20a   :  { %v586_v8 = vmul.f32 %v566_v6, %v1754_v33 }
 0x211   :  { %v568_v7 = vpop.f32.mrf.mxu3 }
 0x212   :  { %v587_v9 = vmul.f32 %v568_v7, %v1757_v35 }
 0x214   :  { %v594_v10 = vpack.c.bf16 %v587_v9, %v586_v8 }
 0x216   :  { %654 = vmatmul.bf16.vlgmr.msrb.gmra.mxu0 %v594_v10 }
 0x219   :  { %v571_v11 = vpop.f32.mrf.mxu3 }
 0x21a   :  { %v588_v13 = vmul.f32 %v571_v11, %v1761_v40 }
 0x221   :  { %v573_v12 = vpop.f32.mrf.mxu3 }
 0x222   :  { %v589_v14 = vmul.f32 %v573_v12, %v1763_v43 }
 0x224   :  { %v595_v17 = vpack.c.bf16 %v589_v14, %v588_v13 }
 0x226   :  { %659 = vmatmul.bf16.gmra.mxu0 %v595_v17 }
 0x229   :  { %v576_v18 = vpop.f32.mrf.mxu3 }
 0x22a   :  { %v590_v20 = vmul.f32 %v576_v18, %v1767_v47 }
 0x231   :  { %v578_v19 = vpop.f32.mrf.mxu3 }
 0x232   :  { %v591_v23 = vmul.f32 %v578_v19, %v1769_v50 }
 0x234   :  { %v596_v24 = vpack.c.bf16 %v591_v23, %v590_v20 }
 0x236   :  { %664 = vmatmul.bf16.gmra.mxu0 %v596_v24 }
 0x239   :  { %v581_v25 = vpop.f32.mrf.mxu3 }
 0x23a   :  { %v592_v27 = vmul.f32 %v581_v25, %v1776_v58 }
 0x241   :  { %v583_v26 = vpop.f32.mrf.mxu3 }
 0x242   :  { %v593_v28 = vmul.f32 %v583_v26, %v1773_v56 }
 0x244   :  { %v597_v29 = vpack.c.bf16 %v593_v28, %v592_v27 }
 0x246   :  { %669 = vmatmul.bf16.gmra.mxu0 %v597_v29 }
 0x249   :  { %v732_v41 = vpop.f32.mrf.mxu3 }
 0x251   :  { %v734_v42 = vpop.f32.mrf.mxu3 }
 0x259   :  { %v737_v48 = vpop.f32.mrf.mxu3 }
 0x261   :  { %v739_v59 = vpop.f32.mrf.mxu3 }
 0x269   :  { %v742_v1 = vpop.f32.mrf.mxu3 }
 0x271   :  { %v744_v7 = vpop.f32.mrf.mxu3 }
 0x279   :  { %v747_v17 = vpop.f32.mrf.mxu3 }
 0x281   :  { %v749_v23 = vpop.f32.mrf.mxu3 }
 0x293   :  { %v655_v44 = vpop.f32.mrf.mxu0 }
 0x294   :  { %v733_v45 = vadd.f32 %v732_v41, %v655_v44 }
 0x296   :  { %v755_v51 = vadd.f32 %v1357_v46, %v733_v45 }
 0x298   :  { %v763_v54 = vmax.f32 %v755_v51, 0.0 }
 0x29b   :  { %v657_v49 = vpop.f32.mrf.mxu0 }
 0x29c   :  { %v735_v52 = vadd.f32 %v734_v42, %v657_v49 }
 0x29e   :  { %v756_v53 = vadd.f32 %v1357_v46, %v735_v52 }
 0x2a0   :  { %v764_v55 = vmax.f32 %v756_v53, 0.0 }
 0x2a2   :  { %v771_v57 = vpack.c.bf16 %v764_v55, %v763_v54 }
 0x2a3   :  { %v660_v60 = vpop.f32.mrf.mxu0 }
 0x2a4   :  { %982 = vmatmul.bf16.vlgmr.msra.gmra.mxu0 %v771_v57  ;;  %v738_v61 = vadd.f32 %v737_v48, %v660_v60 }
 0x2a6   :  { %v757_v63 = vadd.f32 %v1357_v46, %v738_v61  ;;  %v1358_v61 = vld [vmem:[%s1834_s11] ss:$0 sm:$0xff]  ;;  %s1571_s11 = smov [#allocation14]  }
 0x2a7   :  { %s1026_s9 = sshll.u32 %s1571_s11, 4  ;;  %s1027_s9 = int_to_ptr.vmem [resolvable:$true] %s1026_s9 }
 0x2a8   :  { %v765_v3 = vmax.f32 %v757_v63, 0.0 }
 0x2ab   :  { %v662_v62 = vpop.f32.mrf.mxu0 }
 0x2ac   :  { %v740_v0 = vadd.f32 %v739_v59, %v662_v62 }
 0x2ae   :  { %v758_v2 = vadd.f32 %v1357_v46, %v740_v0 }
 0x2b0   :  { %v766_v4 = vmax.f32 %v758_v2, 0.0 }
 0x2b2   :  { %v772_v5 = vpack.c.bf16 %v766_v4, %v765_v3 }
 0x2b3   :  { %v665_v6 = vpop.f32.mrf.mxu0 }
 0x2b4   :  { %987 = vmatmul.bf16.gmra.mxu0 %v772_v5  ;;  %v743_v8 = vadd.f32 %v742_v1, %v665_v6 }
 0x2b6   :  { %v759_v10 = vadd.f32 %v1357_v46, %v743_v8 }
 0x2b8   :  { %v767_v13 = vmax.f32 %v759_v10, 0.0 }
 0x2bb   :  { %v667_v9 = vpop.f32.mrf.mxu0 }
 0x2bc   :  { %v745_v11 = vadd.f32 %v744_v7, %v667_v9 }
 0x2be   :  { %v760_v12 = vadd.f32 %v1357_v46, %v745_v11 }
 0x2c0   :  { %v768_v14 = vmax.f32 %v760_v12, 0.0 }
 0x2c2   :  { %v773_v18 = vpack.c.bf16 %v768_v14, %v767_v13 }
 0x2c3   :  { %v670_v19 = vpop.f32.mrf.mxu0 }
 0x2c4   :  { %992 = vmatmul.bf16.gmra.mxu0 %v773_v18  ;;  %v748_v20 = vadd.f32 %v747_v17, %v670_v19 }
 0x2c6   :  { %v761_v25 = vadd.f32 %v1357_v46, %v748_v20 }
 0x2c8   :  { %v769_v28 = vmax.f32 %v761_v25, 0.0 }
 0x2cb   :  { %v672_v24 = vpop.f32.mrf.mxu0 }
 0x2cc   :  { %v750_v26 = vadd.f32 %v749_v23, %v672_v24 }
 0x2ce   :  { %v762_v27 = vadd.f32 %v1357_v46, %v750_v26 }
 0x2d0   :  { %v770_v29 = vmax.f32 %v762_v27, 0.0 }
 0x2d2   :  { %v774_v30 = vpack.c.bf16 %v770_v29, %v769_v28 }
 0x2d4   :  { %812 = vmatpush.bf16.msrb.mxu1 %v774_v30  ;;  %997 = vmatmul.bf16.gmra.mxu0 %v774_v30 }
 0x2d8   :  { %813 = vmatpush.bf16.msrb.mxu1 %v773_v18 }
 0x2dc   :  { %814 = vmatpush.bf16.msrb.mxu1 %v772_v5 }
 0x2e0   :  { %815 = vmatpush.bf16.msrb.mxu1 %v771_v57 }
 0x2e3   :  { %1212 = vmatmul.msk.bf16.vlgmr.msrb.gmra.mxu1 %vm253_vm0, %v1716_v15  ;;  %v1330_v15 = vld [vmem:[#allocation13 + $0x10] sm:$0xff] }
 0x2e4   :  { %902 = vmatpush.bf16.msrb.mxu2 %v1330_v15 }
 0x2e8   :  { %903 = vmatpush.bf16.msrb.mxu2 %v1329_v38 }
 0x2f3   :  { %1213 = vmatmul.msk.bf16.gmra.mxu1 %vm253_vm0, %v1736_v21  ;;  %v1328_v21 = vld [vmem:[#allocation13] sm:$0xff] }
 0x2f4   :  { %904 = vmatpush.bf16.msrb.mxu2 %v1328_v21 }
 0x303   :  { %1214 = vmatmul.msk.bf16.gmra.mxu1 %vm253_vm0, %v1718_v16 }
 0x313   :  { %1215 = vmatmul.msk.bf16.gmra.mxu1 %vm253_vm0, %v1738_v22 }
 0x360   :  { %v817_v16 = vpop.f32.mrf.mxu1 }
 0x361   :  { %v837_v22 = vmul.f32 %v817_v16, %v1754_v33 }
 0x368   :  { %v819_v39 = vpop.f32.mrf.mxu1 }
 0x369   :  { %v838_v41 = vmul.f32 %v819_v39, %v1757_v35 }
 0x36b   :  { %v845_v42 = vpack.c.bf16 %v838_v41, %v837_v22 }
 0x36d   :  { %905 = vmatmul.bf16.vlgmr.msrb.gmra.mxu2 %v845_v42 }
 0x370   :  { %v822_v44 = vpop.f32.mrf.mxu1 }
 0x371   :  { %v839_v46 = vmul.f32 %v822_v44, %v1761_v40  ;;  %v983_v40 = vpop.f32.mrf.mxu0 }
 0x378   :  { %v824_v45 = vpop.f32.mrf.mxu1 }
 0x379   :  { %v840_v48 = vmul.f32 %v824_v45, %v1763_v43  ;;  %v985_v43 = vpop.f32.mrf.mxu0 }
 0x37b   :  { %v846_v49 = vpack.c.bf16 %v840_v48, %v839_v46 }
 0x37d   :  { %910 = vmatmul.bf16.gmra.mxu2 %v846_v49 }
 0x380   :  { %v827_v51 = vpop.f32.mrf.mxu1 }
 0x381   :  { %v841_v53 = vmul.f32 %v827_v51, %v1767_v47 }
 0x388   :  { %v829_v52 = vpop.f32.mrf.mxu1 }
 0x389   :  { %v842_v54 = vmul.f32 %v829_v52, %v1769_v50  ;;  %v988_v50 = vpop.f32.mrf.mxu0 }
 0x38b   :  { %v847_v55 = vpack.c.bf16 %v842_v54, %v841_v53 }
 0x38d   :  { %915 = vmatmul.bf16.gmra.mxu2 %v847_v55 }
 0x390   :  { %v832_v33 = vpop.f32.mrf.mxu1 }
 0x391   :  { %v843_v57 = vmul.f32 %v832_v33, %v1776_v58  ;;  %v990_v58 = vpop.f32.mrf.mxu0 }
 0x398   :  { %v834_v35 = vpop.f32.mrf.mxu1 }
 0x399   :  { %v844_v59 = vmul.f32 %v834_v35, %v1773_v56  ;;  %v993_v7 = vpop.f32.mrf.mxu0 }
 0x39b   :  { %v848_v60 = vpack.c.bf16 %v844_v59, %v843_v57 }
 0x39d   :  { %920 = vmatmul.bf16.gmra.mxu2 %v848_v60 }
 0x3a1   :  { %v995_v12 = vpop.f32.mrf.mxu0 }
 0x3a9   :  { %v998_v18 = vpop.f32.mrf.mxu0 }
 0x3b1   :  { %v1000_v24 = vpop.f32.mrf.mxu0 }
 0x3f0   :  { %v906_v62 = vpop.f32.mrf.mxu2 }
 0x3f1   :  { %v984_v47 = vadd.f32 %v983_v40, %v906_v62 }
 0x3f3   :  { %v1006_v63 = vadd.f32 %v1358_v61, %v984_v47 }
 0x3f5   :  { %1014 = vst [vmem:[#allocation14] sm:$0xff] %v1006_v63 }
 0x3f8   :  { %v908_v0 = vpop.f32.mrf.mxu2 }
 0x3f9   :  { %v986_v1 = vadd.f32 %v985_v43, %v908_v0 }
 0x3fb   :  { %v1007_v2 = vadd.f32 %v1358_v61, %v986_v1 }
 0x3fd   :  { %1015 = vst [vmem:[#allocation14 + $0x8] sm:$0xff] %v1007_v2 }
 0x400   :  { %v911_v3 = vpop.f32.mrf.mxu2 }
 0x401   :  { %v989_v56 = vadd.f32 %v988_v50, %v911_v3 }
 0x403   :  { %v1008_v4 = vadd.f32 %v1358_v61, %v989_v56 }
 0x405   :  { %1016 = vst [vmem:[#allocation14 + $0x10] sm:$0xff] %v1008_v4 }
 0x408   :  { %v913_v5 = vpop.f32.mrf.mxu2 }
 0x409   :  { %v991_v6 = vadd.f32 %v990_v58, %v913_v5 }
 0x40b   :  { %v1009_v8 = vadd.f32 %v1358_v61, %v991_v6 }
 0x40d   :  { %1017 = vst [vmem:[#allocation14 + $0x18] sm:$0xff] %v1009_v8 }
 0x410   :  { %v916_v9 = vpop.f32.mrf.mxu2 }
 0x411   :  { %v994_v10 = vadd.f32 %v993_v7, %v916_v9 }
 0x413   :  { %v1010_v11 = vadd.f32 %v1358_v61, %v994_v10 }
 0x415   :  { %1018 = vst [vmem:[#allocation14 + $0x20] sm:$0xff] %v1010_v11 }
 0x418   :  { %v918_v13 = vpop.f32.mrf.mxu2 }
 0x419   :  { %v996_v14 = vadd.f32 %v995_v12, %v918_v13 }
 0x41b   :  { %v1011_v17 = vadd.f32 %v1358_v61, %v996_v14 }
 0x41d   :  { %1019 = vst [vmem:[#allocation14 + $0x28] sm:$0xff] %v1011_v17 }
 0x420   :  { %v921_v19 = vpop.f32.mrf.mxu2 }
 0x421   :  { %v999_v20 = vadd.f32 %v998_v18, %v921_v19 }
 0x423   :  { %v1012_v23 = vadd.f32 %v1358_v61, %v999_v20 }
 0x425   :  { %1020 = vst [vmem:[#allocation14 + $0x30] sm:$0xff] %v1012_v23 }
 0x428   :  { %v923_v25 = vpop.f32.mrf.mxu2 }
 0x429   :  { %v1001_v26 = vadd.f32 %v1000_v24, %v923_v25 }
 0x42b   :  { %v1013_v27 = vadd.f32 %v1358_v61, %v1001_v26 }
 0x42d   :  { %1021 = vst [vmem:[#allocation14 + $0x38] sm:$0xff] %v1013_v27 }
 0x42e   :  { %1034 = dma.vmem_to_hbm [thread:$0]  %s1027_s9, 1024, %s1029_s24, [#allocation4], %s1572_s0, %s1572_s0, %s1573_s25  }
 0x42f   :  { %1559 = dma.done.wait [#allocation4], 1024  }
 0x430   :  { %1560 = vsyncadd [#allocation4], 4294966272 }
 0x431   :  { %1039 = vsyncpa [#allocation3], 1 }
 0x432   :  { %1040 = vsyncpa [#allocation6], 1 }
 0x433   :  { %1041 = vsyncpa [#allocation9], 1 }
 0x434   :  { %1042 = vsyncpa [#allocation12], 1 }
 0x435   :  { %1043 = vsyncpa [#allocation4], 1 }

</bundles_post_ra>
